<compile_context>
chip_gen: v7x
topology: tpu7x:2x2x1
jax: 0.10.0
libtpu: 0.0.40
codegen_flags: <defaults>
</compile_context>

<pallas_src>
import jax
import jax.numpy as jnp
import numpy as np
from jax.experimental import pallas as pl
from jax.experimental.pallas import tpu as pltpu


# ---------------------------------------------------------------------------
# Generation-aware VMEM / block budgets
# ---------------------------------------------------------------------------
def _vmem_budgets():
    """Return (scoped_vmem_limit_bytes, per_block_byte_budget)."""
    default_cap = 64 * 1024 * 1024                 # v7x per-TC VMEM (smallest)
    try:
        info = pltpu.get_tpu_info()
        cap = int(getattr(info, "vmem_capacity_bytes", default_cap))
    except Exception:
        cap = default_cap
    # Scoped limit: ~3/4 of physical, never above 96 MiB.
    scoped = min((cap * 3) // 4, 96 * 1024 * 1024)
    # Block budget: (input block + output block) x 2 pipeline buffers
    # = 4 block-sized buffers, plus headroom for params/stats/scratch.
    block = min(scoped // 6, 16 * 1024 * 1024)     # ~8 MiB v7x, ~16 MiB v5e/v6e
    return scoped, block


# ---------------------------------------------------------------------------
# Kernels
# ---------------------------------------------------------------------------
def actnorm_stats_row_kernel(x_ref, sum_ref, sumsq_ref):
    """Per-row sum / sum-of-squares over the full lane extent.

    x_ref: (row_tile, HW) block.  Each block owns its rows completely, so
    outputs are written once per grid step (no resident accumulator) and the
    grid axis is 'parallel'.
    """
    x = x_ref[...].astype(jnp.float32)
    sum_ref[...] = jnp.sum(x, axis=-1, keepdims=True)
    sumsq_ref[...] = jnp.sum(x * x, axis=-1, keepdims=True)


def actnorm_stats_lane_kernel(x_ref, sum_ref, sumsq_ref):
    """Fallback: accumulate per-row sums across lane tiles (resident output)."""
    @pl.when(pl.program_id(0) == 0)
    def _():
        sum_ref[...] = jnp.zeros_like(sum_ref)
        sumsq_ref[...] = jnp.zeros_like(sumsq_ref)

    x = x_ref[...].astype(jnp.float32)
    sum_ref[...] += jnp.sum(x, axis=-1, keepdims=True)
    sumsq_ref[...] += jnp.sum(x * x, axis=-1, keepdims=True)


def actnorm_apply_kernel(x_ref, params_ref, z_ref):
    """z = (x - bias_row) * inv_scale_row.  params_ref: (rows, 2) = [bias, 1/scale]."""
    x = x_ref[...].astype(jnp.float32)
    bias = params_ref[:, 0:1]
    inv = params_ref[:, 1:2]
    z_ref[...] = ((x - bias) * inv).astype(z_ref.dtype)


# ---------------------------------------------------------------------------
# Tile selection
# ---------------------------------------------------------------------------
def _choose_row_tile(R, HW, itemsize, block_budget):
    """Rows per (row_tile, HW) block; None if even 8 rows blow the budget."""
    bytes_per_row = max(HW * itemsize, 1)
    if R <= 8:
        return R if R * bytes_per_row <= block_budget else None
    if 8 * bytes_per_row > block_budget:
        return None                                # -> lane-tiled fallback
    budget_rows = max(8, (block_budget // bytes_per_row) // 8 * 8)
    half_rows = max(8, (R // 2) // 8 * 8)          # >=2 grid steps (v7x: 2 TCs)
    full_rows = (R // 8) * 8
    return max(8, min(budget_rows, half_rows, full_rows))


def _pick_lane_tile(R, HW, itemsize, block_budget):
    """Fallback lane tile: multiple of 128 dividing HW, sized to block_budget."""
    max_lanes = (HW // 128) * 128
    if max_lanes == 0:
        return HW                                  # HW < 128: single full block
    target = max(128, (block_budget // max(R * itemsize, 1)) // 128 * 128)
    if HW >= 256:
        target = min(target, max(128, (HW // 2) // 128 * 128))   # >=2 steps
    target = min(target, max_lanes)
    for cand in range(target, 0, -128):
        if HW % cand == 0:
            return cand
    return HW                                      # no 128-multiple divisor of HW


# ---------------------------------------------------------------------------
# Wrapper
# ---------------------------------------------------------------------------
def actnorm_forward(x, scale, bias, initialized, *, donate_x=False):
    """x: (N, C, H, W); scale/bias: (1, C, 1, 1). Returns (z, logdet, scale, bias)."""
    N, C, H, W = x.shape
    R, HW = N * C, H * W
    itemsize = x.dtype.itemsize

    scoped_vmem, block_budget = _vmem_budgets()
    x2 = x.reshape(R, HW)                          # contiguous view, no HBM transpose

    row_tile = _choose_row_tile(R, HW, itemsize, block_budget)
    if row_tile is not None:
        # Primary path: contiguous (row_tile, full-HW) blocks.
        grid = (pl.cdiv(R, row_tile),)
        x_spec = pl.BlockSpec((row_tile, HW), lambda i: (i, 0))
        stat_spec = pl.BlockSpec((row_tile, 1), lambda i: (i, 0))
        param_spec = pl.BlockSpec((row_tile, 2), lambda i: (i, 0))
        stats_kernel = actnorm_stats_row_kernel
        stats_sem = ("parallel",)
    else:
        # Fallback for enormous HW: lane-tiled with resident accumulator.
        lane_tile = _pick_lane_tile(R, HW, itemsize, block_budget)
        grid = (HW // lane_tile,)
        x_spec = pl.BlockSpec((R, lane_tile), lambda i: (0, i))
        stat_spec = pl.BlockSpec((R, 1), lambda i: (0, 0))
        param_spec = pl.BlockSpec((R, 2), lambda i: (0, 0))
        stats_kernel = actnorm_stats_lane_kernel
        stats_sem = ("arbitrary",)

    if not initialized:
        # Pass 1 (init only): per-row sum / sum-of-squares.
        row_sum, row_sumsq = pl.pallas_call(
            stats_kernel,
            out_shape=(
                jax.ShapeDtypeStruct((R, 1), jnp.float32),
                jax.ShapeDtypeStruct((R, 1), jnp.float32),
            ),
            grid=grid,
            in_specs=[x_spec],
            out_specs=(stat_spec, stat_spec),
            compiler_params=pltpu.CompilerParams(
                dimension_semantics=stats_sem,
                vmem_limit_bytes=scoped_vmem,
            ),
        )(x2)

        # Tiny per-channel finalize in plain XLA (C values).
        # TODO(synk): E[x^2]-mean^2 in f32 can lose precision for large-mean
        # activations; acceptable for one-time init stats.
        m = float(N) * float(HW)
        ch_sum = row_sum.reshape(N, C).sum(axis=0)
        ch_sumsq = row_sumsq.reshape(N, C).sum(axis=0)
        mean_c = ch_sum / m
        var_c = jnp.maximum(ch_sumsq / m - mean_c * mean_c, 0.0)
        scale_c = jnp.sqrt(var_c) + 1e-6           # population std (unbiased=False)
        bias_c = mean_c
        new_scale = scale_c.reshape(1, C, 1, 1).astype(scale.dtype)
        new_bias = bias_c.reshape(1, C, 1, 1).astype(bias.dtype)
    else:
        scale_c = scale.reshape(C).astype(jnp.float32)
        bias_c = bias.reshape(C).astype(jnp.float32)
        new_scale, new_bias = scale, bias

    # Per-row (n, c) params packed as (R, 2) = [bias, 1/scale]; row r = n*C + c.
    bias_rows = jnp.broadcast_to(bias_c.reshape(1, C), (N, C)).reshape(R)
    inv_rows = jnp.broadcast_to((1.0 / scale_c).reshape(1, C), (N, C)).reshape(R)
    params = jnp.stack([bias_rows, inv_rows], axis=-1).astype(jnp.float32)

    # Pass 2 (the only pass once initialized): tiled elementwise affine.
    z2 = pl.pallas_call(
        actnorm_apply_kernel,
        out_shape=jax.ShapeDtypeStruct((R, HW), x.dtype),
        grid=grid,
        in_specs=[x_spec, param_spec],
        out_specs=x_spec,
        input_output_aliases={0: 0} if donate_x else {},
        compiler_params=pltpu.CompilerParams(
            dimension_semantics=("parallel",),
            vmem_limit_bytes=scoped_vmem,
        ),
    )(x2, params)

    z = z2.reshape(N, C, H, W)

    # logdet depends only on the C-element scale vector -> plain XLA.
    logdet = -jnp.sum(jnp.log(jnp.abs(scale_c))) * float(HW)
    return z, logdet, new_scale, new_bias


# ---------------------------------------------------------------------------
# Reference (pure numpy, mirrors the PyTorch forward)
# ---------------------------------------------------------------------------
def _reference(x_np):
    N, C, H, W = x_np.shape
    xcf = x_np.transpose(1, 0, 2, 3).reshape(C, -1).astype(np.float64)
    mean = xcf.mean(1)
    std = xcf.std(1)                               # population std (unbiased=False)
    scale_ref = std + 1e-6
    z_ref = (x_np - mean.reshape(1, C, 1, 1)) / scale_ref.reshape(1, C, 1, 1)
    logdet_ref = -np.log(np.abs(scale_ref)).sum() * H * W
    return z_ref, logdet_ref


# ---------------------------------------------------------------------------
# Main
# ---------------------------------------------------------------------------
if __name__ == "__main__":
    key = jax.random.PRNGKey(0)
    ok = True

    # Main toy case + one multi-step row grid case + the module's default C=3.
    shapes = [(2, 4, 16, 16), (2, 8, 32, 32), (2, 3, 16, 16)]
    for idx, (N, C, H, W) in enumerate(shapes):
        k = jax.random.fold_in(key, idx)
        x = jax.random.normal(k, (N, C, H, W), dtype=jnp.float32) * 2.0 + 0.5

        # Deterministic parameter init per __init__ (param_dim = (1, C, 1, 1)).
        scale0 = jnp.ones((1, C, 1, 1), jnp.float32)
        bias0 = jnp.zeros((1, C, 1, 1), jnp.float32)

        # First call: initialized == 0 -> data-dependent init.
        z, logdet, scale1, bias1 = actnorm_forward(x, scale0, bias0, initialized=False)
        # Second call: initialized -> apply stored params.
        z2, logdet2, _, _ = actnorm_forward(x, scale1, bias1, initialized=True)
        jax.block_until_ready((z, logdet, z2, logdet2))

        z_ref, logdet_ref = _reference(np.asarray(x))
        ok &= np.allclose(np.asarray(z), z_ref, atol=1e-4, rtol=1e-4)
        ok &= np.allclose(float(logdet), logdet_ref, atol=1e-4, rtol=1e-4)
        ok &= np.allclose(np.asarray(z2), z_ref, atol=1e-4, rtol=1e-4)
        ok &= np.allclose(float(logdet2), logdet_ref, atol=1e-4, rtol=1e-4)

    assert ok
    print("KERNEL_OK")
</pallas_src>

<mosaic_0001>
module attributes {stable_mosaic.version = 11 : i64} {
  func.func @actnorm_stats_row_kernel(%arg0: i32, %arg1: memref<8x256xf32, #tpu.memory_space<vmem>>, %arg2: memref<8x1xf32, #tpu.memory_space<vmem>>, %arg3: memref<8x1xf32, #tpu.memory_space<vmem>>) attributes {dimension_semantics = [#tpu.dimension_semantics<parallel>], iteration_bounds = array<i64: 1>, scalar_prefetch = 0 : i64, scratch_operands = 0 : i64, tpu.core_type = #tpu.core_type<tc>, window_params = [{transform_indices = @transform_0, window_bounds = array<i64: 8, 256>}, {transform_indices = @transform_1, window_bounds = array<i64: 8, 1>}, {transform_indices = @transform_2, window_bounds = array<i64: 8, 1>}]} {
    %c0 = arith.constant 0 : index
    %c0_0 = arith.constant 0 : index
    %0 = vector.load %arg1[%c0, %c0_0] : memref<8x256xf32, #tpu.memory_space<vmem>>, vector<8x256xf32>
    %cst = arith.constant dense<0.000000e+00> : vector<8xf32>
    %1 = vector.multi_reduction <add>, %0, %cst [1] : vector<8x256xf32> to vector<8xf32>
    %2 = vector.shape_cast %1 : vector<8xf32> to vector<8x1xf32>
    %c0_1 = arith.constant 0 : index
    %c0_2 = arith.constant 0 : index
    %3 = vector.load %arg2[%c0_1, %c0_2] : memref<8x1xf32, #tpu.memory_space<vmem>>, vector<8x1xf32>
    tpu.vector_store %arg2[%c0_1, %c0_2], %2 {strides = array<i32>} : memref<8x1xf32, #tpu.memory_space<vmem>>, vector<8x1xf32>,
    %4 = arith.mulf %0, %0 : vector<8x256xf32>
    %cst_3 = arith.constant dense<0.000000e+00> : vector<8xf32>
    %5 = vector.multi_reduction <add>, %4, %cst_3 [1] : vector<8x256xf32> to vector<8xf32>
    %6 = vector.shape_cast %5 : vector<8xf32> to vector<8x1xf32>
    %c0_4 = arith.constant 0 : index
    %c0_5 = arith.constant 0 : index
    %7 = vector.load %arg3[%c0_4, %c0_5] : memref<8x1xf32, #tpu.memory_space<vmem>>, vector<8x1xf32>
    tpu.vector_store %arg3[%c0_4, %c0_5], %6 {strides = array<i32>} : memref<8x1xf32, #tpu.memory_space<vmem>>, vector<8x1xf32>,
    return
  }
  func.func @transform_0(%arg0: i32) -> (i32, i32) {
    %c0_i32 = arith.constant 0 : i32
    %c0_i32_0 = arith.constant 0 : i32
    return %arg0, %c0_i32 : i32, i32
  }
  func.func @transform_1(%arg0: i32) -> (i32, i32) {
    %c0_i32 = arith.constant 0 : i32
    %c0_i32_0 = arith.constant 0 : i32
    return %arg0, %c0_i32 : i32, i32
  }
  func.func @transform_2(%arg0: i32) -> (i32, i32) {
    %c0_i32 = arith.constant 0 : i32
    %c0_i32_0 = arith.constant 0 : i32
    return %arg0, %c0_i32 : i32, i32
  }
}

</mosaic_0001>

<bundles_post_ra>
// kernel: tpu_custom_call.1
= control target key start
LH: loop header
LB: loop body
LE: loop exit
PB: predicated region body
PF: predicated region fallthrough
CT: control target
= control target key end

     0   :  { %8 = vsyncpa [#allocation3], 0  ;;  %s69_s9 = smov [#allocation2]   ;;  %s103_s0 = inlined_call_operand.hbm [shape: f32[8,256], index: 0, kind: input, shape index: {}]   ;;  %s104_s1 = inlined_call_operand.vmem [shape: f32[8,1], index: 1, kind: output, shape index: {0}]   ;;  %s105_s2 = inlined_call_operand.vmem [shape: f32[8,1], index: 2, kind: output, shape index: {1}]  }
   0x1   :  { %s15_s10 = sshll.u32 %s69_s9, 4  ;;  %s45_s13 = scalar_lea.hbm %s103_s0, 256  ;;  %s16_s10 = int_to_ptr.vmem [resolvable:$true] %s15_s10 }
   0x2   :  { %p46_p0 = scmp.ne.s32.totalorder %s103_s0, %s45_s13  ;;  %p49_p1 = scmp.lt.u32.totalorder %s45_s13, %s103_s0 }
   0x4   :  { %p51_p2 = pnand %p49_p1, %p46_p0 }
   0x6   :  { %54 = shalt.err (!%p51_p2)
}
   0x7   :  { %s55_s18 = scalar_lea.vmem %s16_s10, 256  ;;  %p60_p4 = scmp.lt.s32.totalorder %s16_s10, %s16_s10 }
   0x8   :  { %p56_p3 = scmp.ne.s32.totalorder %s16_s10, %s55_s18  ;;  %p61_p5 = scmp.lt.s32.totalorder %s55_s18, %s55_s18 }
   0xa   :  { %p62_p6 = por %p61_p5, %p60_p4 }
   0xc   :  { %p63_p7 = pnand %p62_p6, %p56_p3 }
   0xe   :  { %66 = shalt.err (!%p63_p7)
}
   0xf   :  { %18 = dma.hbm_to_vmem [thread:$0]  %s103_s0, 256, %s16_s10, [#allocation3]  }
  0x10   :  { %67 = dma.done.wait [#allocation3], 256  }
  0x11   :  { %68 = vsyncadd [#allocation3], 4294967040  ;;  %v22_v0 = vld [vmem:[#allocation2] sm:$0xff]  ;;  %v23_v1 = vld [vmem:[#allocation2 + $0x8] sm:$0xff]  ;;  %vm27_vm0 = vcmask 7168  }
  0x12   :  { %v24_v2 = vadd.f32 %v23_v1, %v22_v0  ;;  %v29_v3 = vmul.f32 %v22_v0, %v22_v0  ;;  %v30_v4 = vmul.f32 %v23_v1, %v23_v1 }
  0x14   :  { %25 = vadd.xlane.f32.xlu0 %v24_v2  ;;  %v31_v5 = vadd.f32 %v30_v4, %v29_v3 }
  0x18   :  { %32 = vadd.xlane.f32.xlu0 %v31_v5 }
  0xa1   :  { %v26_v6 = vpop.xlane.xlu0 %25 }
  0xa2   :  { %28 = vst.msk [vmem:[%s104_s1] sm:$0xff] %vm27_vm0, %v26_v6 }
  0xa5   :  { %v33_v7 = vpop.xlane.xlu0 %32 }
  0xa6   :  { %34 = vst.msk [vmem:[%s105_s2] sm:$0xff] %vm27_vm0, %v33_v7 }
  0xa7   :  { %43 = vsyncpa [#allocation3], 1 }

</bundles_post_ra>
